<compile_context>
chip_gen: v7x
topology: tpu7x:2x2x1
jax: 0.10.0
libtpu: 0.0.40
codegen_flags: <defaults>
</compile_context>

<pallas_src>
import math

import jax
import jax.numpy as jnp
from jax.experimental import pallas as pl
from jax.experimental.pallas import tpu as pltpu

_LANE = 128
_SUBLANE = 8


def _silu_kernel(x_ref, o_ref):
    # sigmoid(x) = 0.5 * (1 + tanh(x / 2))  =>  silu(x) = 0.5 * x * (1 + tanh(x/2))
    # One EUP op (tanh) + VALU mul/add per element; compute in f32, cast on store.
    x = x_ref[...].astype(jnp.float32)
    y = 0.5 * x * (1.0 + jnp.tanh(0.5 * x))
    o_ref[...] = y.astype(o_ref.dtype)


def silu_pallas(x, *, block_bytes=2 * 1024 * 1024):
    """Elementwise SiLU via a Pallas TPU kernel. Preserves shape and dtype."""
    orig_shape = x.shape
    dtype = x.dtype
    n = math.prod(orig_shape) if orig_shape else 1
    if n == 0:
        return x

    itemsize = jnp.dtype(dtype).itemsize

    # ---------------- Build a lane-dense 2D view (R, C) ----------------
    pad_tail = 0
    if x.ndim >= 2 and orig_shape[-1] % _LANE == 0:
        # Fast path: last dim already lane-aligned; collapsing leading dims is free.
        C = orig_shape[-1]
        x2 = x.reshape(-1, C)
    else:
        # Flatten fully and pick a lane-aligned width that divides the total
        # element count exactly (no padding, no extra HBM pass).
        C = 0
        for cand in (4096, 2048, 1024, 512, 384, 256, 128):
            if n % cand == 0:
                C = cand
                break
        if C:
            x2 = x.reshape(-1, C)
        elif x.ndim >= 2:
            # Ragged last dim that 128 does not divide into: keep it as a
            # full-extent lane block (only the final vreg column is masked).
            C = orig_shape[-1]
            x2 = x.reshape(-1, C)
        else:
            # Rare fallback (ragged 1-D / scalar): pad the flat tail to a lane multiple.
            C = _LANE
            pad_tail = (-n) % C
            x2 = jnp.pad(x.reshape(-1), (0, pad_tail)).reshape(-1, C)

    R, C = x2.shape

    # ---------------- Byte-budgeted tile sizes ----------------
    # Column tile: full C when an (8, C) block fits the budget, or when C is not
    # a 128-multiple (full-extent is then required); otherwise a 128-multiple.
    if C * itemsize * _SUBLANE <= block_bytes or C % _LANE != 0:
        tc = C
    else:
        tc = max(_LANE, (block_bytes // (_SUBLANE * itemsize * _LANE)) * _LANE)
        tc = min(tc, C)

    # Row tile: fill the block budget, rounded down to a sublane multiple.
    tr_budget = max(1, block_bytes // max(1, tc * itemsize))
    if tr_budget >= R:
        tr = R                       # full extent — always legal
    else:
        tr = max(_SUBLANE, (tr_budget // _SUBLANE) * _SUBLANE)

    grid = (pl.cdiv(R, tr), pl.cdiv(C, tc))

    # Pipelined footprint ~= 2 (in+out) x 2 (double-buffer) x block_bytes.
    block_nbytes = tr * tc * itemsize
    vmem_limit = int(min(max(6 * block_nbytes, 16 * 1024 * 1024), 32 * 1024 * 1024))

    out2 = pl.pallas_call(
        _silu_kernel,
        out_shape=jax.ShapeDtypeStruct((R, C), dtype),
        grid=grid,
        in_specs=[pl.BlockSpec((tr, tc), lambda i, j: (i, j))],
        out_specs=pl.BlockSpec((tr, tc), lambda i, j: (i, j)),
        compiler_params=pltpu.CompilerParams(
            dimension_semantics=("parallel", "parallel"),
            vmem_limit_bytes=vmem_limit,
        ),
        cost_estimate=pl.CostEstimate(
            flops=4 * n,
            transcendentals=n,
            bytes_accessed=2 * n * itemsize,
        ),
    )(x2)

    # ---------------- Restore original shape ----------------
    if pad_tail:
        return out2.reshape(-1)[:n].reshape(orig_shape)
    return out2.reshape(orig_shape)


if __name__ == "__main__":
    key = jax.random.PRNGKey(0)
    k1, k2 = jax.random.split(key)

    # Small activation-like tensor (batch, seq, hidden) — exercises the
    # "flatten to lane-dense width" path (32 < 128, total 512 = 1 x 512 lanes).
    x = jax.random.normal(k1, (2, 8, 32), dtype=jnp.float32)
    y = jax.block_until_ready(silu_pallas(x))
    y_ref = x * jax.nn.sigmoid(x)
    assert y.shape == x.shape and y.dtype == x.dtype
    assert jnp.allclose(y, y_ref, atol=1e-5, rtol=1e-5)

    # Lane-aligned bf16 case — exercises the fast (no-reshape-trickery) path
    # and the in-kernel f32 compute / cast-on-store.
    xb = jax.random.normal(k2, (2, 16, 256), dtype=jnp.bfloat16)
    yb = jax.block_until_ready(silu_pallas(xb))
    yb_ref = (xb.astype(jnp.float32) * jax.nn.sigmoid(xb.astype(jnp.float32))).astype(jnp.bfloat16)
    assert yb.shape == xb.shape and yb.dtype == xb.dtype
    assert jnp.allclose(yb.astype(jnp.float32), yb_ref.astype(jnp.float32), atol=2e-2, rtol=2e-2)

    print("KERNEL_OK")
</pallas_src>

<mosaic_0001>
module attributes {stable_mosaic.version = 11 : i64} {
  func.func @_silu_kernel(%arg0: i32, %arg1: i32, %arg2: memref<1x512xf32, #tpu.memory_space<vmem>>, %arg3: memref<1x512xf32, #tpu.memory_space<vmem>>) attributes {dimension_semantics = [#tpu.dimension_semantics<parallel>, #tpu.dimension_semantics<parallel>], iteration_bounds = array<i64: 1, 1>, scalar_prefetch = 0 : i64, scratch_operands = 0 : i64, tpu.core_type = #tpu.core_type<tc>, window_params = [{transform_indices = @transform_0, window_bounds = array<i64: 1, 512>}, {transform_indices = @transform_1, window_bounds = array<i64: 1, 512>}]} {
    %c0 = arith.constant 0 : index
    %c0_0 = arith.constant 0 : index
    %0 = vector.load %arg2[%c0, %c0_0] : memref<1x512xf32, #tpu.memory_space<vmem>>, vector<1x512xf32>
    %cst = arith.constant 5.000000e-01 : f32
    %1 = vector.broadcast %cst : f32 to vector<1x512xf32>
    %2 = arith.mulf %1, %0 : vector<1x512xf32>
    %cst_1 = arith.constant 5.000000e-01 : f32
    %3 = vector.broadcast %cst_1 : f32 to vector<1x512xf32>
    %4 = arith.mulf %3, %0 : vector<1x512xf32>
    %5 = math.tanh %4 : vector<1x512xf32>
    %cst_2 = arith.constant 1.000000e+00 : f32
    %6 = vector.broadcast %cst_2 : f32 to vector<1x512xf32>
    %7 = arith.addf %6, %5 : vector<1x512xf32>
    %8 = arith.mulf %2, %7 : vector<1x512xf32>
    %c0_3 = arith.constant 0 : index
    %c0_4 = arith.constant 0 : index
    %9 = vector.load %arg3[%c0_3, %c0_4] : memref<1x512xf32, #tpu.memory_space<vmem>>, vector<1x512xf32>
    tpu.vector_store %arg3[%c0_3, %c0_4], %8 {strides = array<i32>} : memref<1x512xf32, #tpu.memory_space<vmem>>, vector<1x512xf32>,
    return
  }
  func.func @transform_0(%arg0: i32, %arg1: i32) -> (i32, i32) {
    %c0_i32 = arith.constant 0 : i32
    return %arg0, %arg1 : i32, i32
  }
  func.func @transform_1(%arg0: i32, %arg1: i32) -> (i32, i32) {
    %c0_i32 = arith.constant 0 : i32
    return %arg0, %arg1 : i32, i32
  }
}

</mosaic_0001>

<bundles_post_ra>
// kernel: tpu_custom_call.1
= control target key start
LH: loop header
LB: loop body
LE: loop exit
PB: predicated region body
PF: predicated region fallthrough
CT: control target
= control target key end

     0   :  { %6 = vsyncpa [#allocation3], 0  ;;  %s134_s0 = inlined_call_operand.hbm [shape: f32[1,512], index: 0, kind: input, shape index: {}]   ;;  %s135_s1 = inlined_call_operand.hbm [shape: f32[1,512], index: 1, kind: output, shape index: {}]  }
   0x1   :  { %7 = vsyncpa [#allocation4], 0  ;;  %s98_s6 = smov [#allocation2]   ;;  %s50_s10 = scalar_lea.hbm %s134_s0, 64 }
   0x2   :  { %s14_s7 = sshll.u32 %s98_s6, 4  ;;  %p51_p0 = scmp.ne.s32.totalorder %s134_s0, %s50_s10  ;;  %s15_s7 = int_to_ptr.vmem [resolvable:$true] %s14_s7 }
   0x3   :  { %p54_p1 = scmp.lt.u32.totalorder %s50_s10, %s134_s0 }
   0x5   :  { %p56_p2 = pnand %p54_p1, %p51_p0 }
   0x7   :  { %59 = shalt.err (!%p56_p2)
}
   0x8   :  { %s60_s15 = scalar_lea.vmem %s15_s7, 64  ;;  %p65_p4 = scmp.lt.s32.totalorder %s15_s7, %s15_s7 }
   0x9   :  { %p61_p3 = scmp.ne.s32.totalorder %s15_s7, %s60_s15  ;;  %p66_p5 = scmp.lt.s32.totalorder %s60_s15, %s60_s15 }
   0xb   :  { %p67_p6 = por %p66_p5, %p65_p4 }
   0xd   :  { %p68_p7 = pnand %p67_p6, %p61_p3 }
   0xf   :  { %71 = shalt.err (!%p68_p7)
}
  0x10   :  { %17 = dma.hbm_to_vmem [thread:$0]  %s134_s0, 64, %s15_s7, [#allocation3]  }
  0x11   :  { %94 = dma.done.wait [#allocation3], 64  }
  0x12   :  { %95 = vsyncadd [#allocation3], 4294967232  ;;  %v21_v0 = vld [vmem:[#allocation2] sm:$0xf]  ;;  %v26_v2 = vlaneseq  ;;  %s99_s18 = smov [#allocation5]  }
  0x13   :  { %v22_v1 = vmul.f32 0.5, %v21_v0  ;;  %s37_s19 = sshll.u32 %s99_s18, 4  ;;  %s38_s19 = int_to_ptr.vmem [resolvable:$true] %s37_s19 }
  0x14   :  { %vm28_vm0 = vcmp.lt.s32.totalorder %v26_v2, 512  ;;  %s72_s20 = scalar_lea.vmem %s38_s19, 64  ;;  %p77_p9 = scmp.lt.s32.totalorder %s38_s19, %s38_s19 }
  0x15   :  { %48 = vtanh.f32 %v22_v1  ;;  %p73_p8 = scmp.ne.s32.totalorder %s38_s19, %s72_s20  ;;  %p78_p10 = scmp.lt.s32.totalorder %s72_s20, %s72_s20 }
  0x17   :  { %p79_p11 = por %p78_p10, %p77_p9 }
  0x19   :  { %p80_p12 = pnand %p79_p11, %p73_p8 }
  0x1f   :  { %v49_v3 = vpop.eup %48 }
  0x20   :  { %v24_v4 = vadd.f32 1.0, %v49_v3 }
  0x22   :  { %v25_v5 = vmul.f32 %v24_v4, %v22_v1 }
  0x24   :  { %30 = vst.msk [vmem:[#allocation5] sm:$0xf] %vm28_vm0, %v25_v5 }
  0x25   :  { %83 = shalt.err (!%p80_p12)
}
  0x26   :  { %s84_s22 = scalar_lea.hbm %s135_s1, 64 }
  0x27   :  { %p85_p13 = scmp.ne.s32.totalorder %s135_s1, %s84_s22  ;;  %p88_p0 = scmp.lt.u32.totalorder %s84_s22, %s135_s1 }
  0x29   :  { %p90_p1 = pnand %p88_p0, %p85_p13 }
  0x2b   :  { %93 = shalt.err (!%p90_p1)
}
  0x2c   :  { %40 = dma.vmem_to_hbm [thread:$0]  %s38_s19, 64, %s135_s1, [#allocation4]  }
  0x2d   :  { %96 = dma.done.wait [#allocation4], 64  }
  0x2e   :  { %97 = vsyncadd [#allocation4], 4294967232 }
  0x2f   :  { %44 = vsyncpa [#allocation3], 1 }
  0x30   :  { %45 = vsyncpa [#allocation4], 1 }

</bundles_post_ra>
